<compile_context>
chip_gen: v6e
topology: v6e:2x2x1
jax: 0.10.0
libtpu: 0.0.40
codegen_flags: <defaults>
</compile_context>

<pallas_src>
import functools

import jax
import jax.numpy as jnp
from jax.experimental import pallas as pl
from jax.experimental.pallas import tpu as pltpu


def _edge_nn_kernel(x_ref, emb_ref, w_ref, b_ref, out_ref):
    x = x_ref[...]                                    # (tm, 1+Cin) f32
    tm = x.shape[0]
    n_types, cout = emb_ref.shape

    # Embedding lookup as a one-hot matmul on the MXU (table is tiny; gathers
    # are expensive on TPU).
    ids = x[:, 0:1].astype(jnp.int32)                 # (tm, 1)
    iota = jax.lax.broadcasted_iota(jnp.int32, (tm, n_types), 1)
    onehot = (iota == ids).astype(jnp.float32)        # (tm, n_types)
    y = jnp.dot(onehot, emb_ref[...], preferred_element_type=jnp.float32)

    # Fused h/g: x @ [[0|0],[w_h|w_g]] + [b_h|b_g].  The zero first weight row
    # cancels the edge-type column, so the whole unsplit x block feeds the MXU.
    hg = jnp.dot(x, w_ref[...], preferred_element_type=jnp.float32) + b_ref[...]
    h = hg[:, :cout]
    g = hg[:, cout:]

    out_ref[...] = jnp.maximum(y * h + g, 0.0)


def _round_up(a, b):
    return ((a + b - 1) // b) * b


@functools.partial(jax.jit, static_argnames=("tm",))
def edge_nn_forward(x, emb_table, w_h, b_h, w_g, b_g, *, tm=1024):
    """x: [B, E, 1 + in_channels]; returns [B, E, out_channels]."""
    B, E = x.shape[0], x.shape[1]
    in_channels, out_channels = w_h.shape
    n_types = emb_table.shape[0]

    M = B * E
    tm = _round_up(max(int(tm), 8), 8)
    tm_eff = min(tm, _round_up(M, 8))       # don't over-tile tiny problems
    M_pad = _round_up(M, tm_eff)            # pad rows instead of asserting divisibility

    x2d = x[..., :1 + in_channels].astype(jnp.float32).reshape(M, 1 + in_channels)
    if M_pad != M:
        x2d = jnp.pad(x2d, ((0, M_pad - M), (0, 0)))

    # Fused weights: zero row (edge-type column) + [w_h | w_g]; fused bias.
    w_full = jnp.concatenate(
        [jnp.zeros((1, 2 * out_channels), jnp.float32),
         jnp.concatenate([w_h, w_g], axis=1).astype(jnp.float32)],
        axis=0)                                                   # (1+Cin, 2*Cout)
    b_full = jnp.concatenate([b_h, b_g]).astype(jnp.float32).reshape(1, 2 * out_channels)

    grid = (M_pad // tm_eff,)
    out = pl.pallas_call(
        _edge_nn_kernel,
        out_shape=jax.ShapeDtypeStruct((M_pad, out_channels), jnp.float32),
        grid_spec=pltpu.PrefetchScalarGridSpec(
            num_scalar_prefetch=0,
            grid=grid,
            in_specs=[
                pl.BlockSpec((tm_eff, 1 + in_channels), lambda i: (i, 0)),      # x (tiled)
                pl.BlockSpec((n_types, out_channels), lambda i: (0, 0)),        # embedding (resident)
                pl.BlockSpec((1 + in_channels, 2 * out_channels), lambda i: (0, 0)),  # fused W (resident)
                pl.BlockSpec((1, 2 * out_channels), lambda i: (0, 0)),          # fused bias (resident)
            ],
            out_specs=pl.BlockSpec((tm_eff, out_channels), lambda i: (i, 0)),
        ),
        compiler_params=pltpu.CompilerParams(
            dimension_semantics=("parallel",)),
    )(x2d, emb_table.astype(jnp.float32), w_full, b_full)

    return out[:M].reshape(B, E, out_channels)


def _reference(x, emb_table, w_h, b_h, w_g, b_g, in_channels):
    ids = x[..., 0].astype(jnp.int32)
    feat = x[..., 1:1 + in_channels].astype(jnp.float32)
    y = emb_table[ids]
    h = feat @ w_h + b_h
    g = feat @ w_g + b_g
    return jnp.maximum(y * h + g, 0.0)


if __name__ == "__main__":
    # Small shapes consistent with the module's forward.
    B, E = 2, 8
    in_channels, out_channels = 4, 32
    n_edge_types = 25

    key = jax.random.PRNGKey(0)
    k_ids, k_feat, k_emb, k_wh, k_bh, k_wg, k_bg = jax.random.split(key, 7)

    edge_types = jax.random.randint(k_ids, (B, E, 1), 0, n_edge_types).astype(jnp.float32)
    feats = jax.random.normal(k_feat, (B, E, in_channels), dtype=jnp.float32)
    x = jnp.concatenate([edge_types, feats], axis=-1)   # [B, E, 1 + in_channels]

    emb_table = jax.random.normal(k_emb, (n_edge_types, out_channels), dtype=jnp.float32)
    w_h = jax.random.normal(k_wh, (in_channels, out_channels), dtype=jnp.float32) * 0.1
    b_h = jax.random.normal(k_bh, (out_channels,), dtype=jnp.float32) * 0.1
    w_g = jax.random.normal(k_wg, (in_channels, out_channels), dtype=jnp.float32) * 0.1
    b_g = jax.random.normal(k_bg, (out_channels,), dtype=jnp.float32) * 0.1

    out = edge_nn_forward(x, emb_table, w_h, b_h, w_g, b_g, tm=1024)
    out = jax.block_until_ready(out)

    ref = _reference(x, emb_table, w_h, b_h, w_g, b_g, in_channels)
    assert out.shape == (B, E, out_channels)
    assert jnp.allclose(out, ref, atol=1e-5, rtol=1e-5), "mismatch vs reference"

    print("KERNEL_OK")
</pallas_src>

<mosaic_0001>
module attributes {stable_mosaic.version = 11 : i64} {
  func.func @_edge_nn_kernel(%arg0: i32, %arg1: memref<16x5xf32, #tpu.memory_space<vmem>>, %arg2: memref<25x32xf32, #tpu.memory_space<vmem>>, %arg3: memref<5x64xf32, #tpu.memory_space<vmem>>, %arg4: memref<1x64xf32, #tpu.memory_space<vmem>>, %arg5: memref<16x32xf32, #tpu.memory_space<vmem>>) attributes {dimension_semantics = [#tpu.dimension_semantics<parallel>], iteration_bounds = array<i64: 1>, scalar_prefetch = 0 : i64, scratch_operands = 0 : i64, tpu.core_type = #tpu.core_type<tc>, window_params = [{transform_indices = @transform_0, window_bounds = array<i64: 16, 5>}, {pipeline_mode = #tpu.pipeline_mode<synchronous>, transform_indices = @transform_1, window_bounds = array<i64: 25, 32>}, {pipeline_mode = #tpu.pipeline_mode<synchronous>, transform_indices = @transform_2, window_bounds = array<i64: 5, 64>}, {pipeline_mode = #tpu.pipeline_mode<synchronous>, transform_indices = @transform_3, window_bounds = array<i64: 1, 64>}, {transform_indices = @transform_4, window_bounds = array<i64: 16, 32>}]} {
    %c0 = arith.constant 0 : index
    %c0_0 = arith.constant 0 : index
    %0 = vector.load %arg1[%c0, %c0_0] : memref<16x5xf32, #tpu.memory_space<vmem>>, vector<16x5xf32>
    %1 = vector.extract_strided_slice %0 {offsets = [0, 0], sizes = [16, 1], strides = [1, 1]} : vector<16x5xf32> to vector<16x1xf32>
    %2 = arith.fptosi %1 : vector<16x1xf32> to vector<16x1xi32>
    %3 = tpu.iota {dimensions = array<i32: 1>} : vector<16x25xi32>
    %4 = vector.broadcast %2 : vector<16x1xi32> to vector<16x25xi32>
    %5 = arith.cmpi eq, %3, %4 : vector<16x25xi32>
    %6 = arith.extui %5 : vector<16x25xi1> to vector<16x25xi32>
    %7 = arith.sitofp %6 : vector<16x25xi32> to vector<16x25xf32>
    %c0_1 = arith.constant 0 : index
    %c0_2 = arith.constant 0 : index
    %8 = vector.load %arg2[%c0_1, %c0_2] : memref<25x32xf32, #tpu.memory_space<vmem>>, vector<25x32xf32>
    %cst = arith.constant dense<0.000000e+00> : vector<16x32xf32>
    %9 = tpu.matmul %7, %8, %cst {dimension_numbers = #tpu.dot_dimension_numbers<[1], [0], [0], [1], [0, 0, 1, 1], [], []>} : vector<16x25xf32>, vector<25x32xf32>, vector<16x32xf32> -> vector<16x32xf32>
    %c0_3 = arith.constant 0 : index
    %c0_4 = arith.constant 0 : index
    %10 = vector.load %arg3[%c0_3, %c0_4] : memref<5x64xf32, #tpu.memory_space<vmem>>, vector<5x64xf32>
    %cst_5 = arith.constant dense<0.000000e+00> : vector<16x64xf32>
    %11 = tpu.matmul %0, %10, %cst_5 {dimension_numbers = #tpu.dot_dimension_numbers<[1], [0], [0], [1], [0, 0, 1, 1], [], []>} : vector<16x5xf32>, vector<5x64xf32>, vector<16x64xf32> -> vector<16x64xf32>
    %c0_6 = arith.constant 0 : index
    %c0_7 = arith.constant 0 : index
    %12 = vector.load %arg4[%c0_6, %c0_7] : memref<1x64xf32, #tpu.memory_space<vmem>>, vector<1x64xf32>
    %13 = vector.broadcast %12 : vector<1x64xf32> to vector<16x64xf32>
    %14 = arith.addf %11, %13 : vector<16x64xf32>
    %15 = vector.extract_strided_slice %14 {offsets = [0, 0], sizes = [16, 32], strides = [1, 1]} : vector<16x64xf32> to vector<16x32xf32>
    %16 = vector.extract_strided_slice %14 {offsets = [0, 32], sizes = [16, 32], strides = [1, 1]} : vector<16x64xf32> to vector<16x32xf32>
    %17 = arith.mulf %9, %15 : vector<16x32xf32>
    %18 = arith.addf %17, %16 : vector<16x32xf32>
    %cst_8 = arith.constant 0.000000e+00 : f32
    %19 = vector.broadcast %cst_8 : f32 to vector<16x32xf32>
    %20 = arith.maximumf %18, %19 : vector<16x32xf32>
    %c0_9 = arith.constant 0 : index
    %c0_10 = arith.constant 0 : index
    %21 = vector.load %arg5[%c0_9, %c0_10] : memref<16x32xf32, #tpu.memory_space<vmem>>, vector<16x32xf32>
    tpu.vector_store %arg5[%c0_9, %c0_10], %20 {strides = array<i32>} : memref<16x32xf32, #tpu.memory_space<vmem>>, vector<16x32xf32>,
    return
  }
  func.func @transform_0(%arg0: i32) -> (i32, i32) {
    %c0_i32 = arith.constant 0 : i32
    %c0_i32_0 = arith.constant 0 : i32
    return %arg0, %c0_i32 : i32, i32
  }
  func.func @transform_1(%arg0: i32) -> (i32, i32) {
    %c0_i32 = arith.constant 0 : i32
    %c0_i32_0 = arith.constant 0 : i32
    %c0_i32_1 = arith.constant 0 : i32
    return %c0_i32, %c0_i32_0 : i32, i32
  }
  func.func @transform_2(%arg0: i32) -> (i32, i32) {
    %c0_i32 = arith.constant 0 : i32
    %c0_i32_0 = arith.constant 0 : i32
    %c0_i32_1 = arith.constant 0 : i32
    return %c0_i32, %c0_i32_0 : i32, i32
  }
  func.func @transform_3(%arg0: i32) -> (i32, i32) {
    %c0_i32 = arith.constant 0 : i32
    %c0_i32_0 = arith.constant 0 : i32
    %c0_i32_1 = arith.constant 0 : i32
    return %c0_i32, %c0_i32_0 : i32, i32
  }
  func.func @transform_4(%arg0: i32) -> (i32, i32) {
    %c0_i32 = arith.constant 0 : i32
    %c0_i32_0 = arith.constant 0 : i32
    return %arg0, %c0_i32 : i32, i32
  }
}

</mosaic_0001>

<bundles_post_ra>
// kernel: edge_nn_forward.1
= control target key start
LH: loop header
LB: loop body
LE: loop exit
PB: predicated region body
PF: predicated region fallthrough
CT: control target
= control target key end

     0   :  { %vm141_vm0 = vcmask 1044480   ;;  %vm134_vm1 = vcmask 39936   ;;  %v320_v2 = vmov 0   ;;  %vm47_vm2 = vcmask 1040384   ;;  %s378_s0 = inlined_call_operand.vmem [shape: f32[16,5], index: 0, kind: input, shape index: {}]   ;;  %s379_s1 = inlined_call_operand.vmem [shape: f32[25,32], index: 1, kind: input, shape index: {}]   ;;  %s380_s2 = inlined_call_operand.vmem [shape: f32[5,64], index: 2, kind: input, shape index: {}]   ;;  %s381_s3 = inlined_call_operand.vmem [shape: f32[1,64], index: 3, kind: input, shape index: {}]   ;;  %s382_s4 = inlined_call_operand.hbm [shape: f32[16,32], index: 4, kind: output, shape index: {}]  }
   0x1   :  { %v18_v0 = vld [vmem:[%s378_s0] sm:$0xff]  ;;  %297 = vset.pattern.permute.xlu0 %v320_v2  ;;  %v19_v4 = vld [vmem:[%s378_s0 + $0x8] sm:$0xff]  ;;  %v39_v5 = vld [vmem:[%s379_s1 + $0x18] sm:$0x1] }
   0x2   :  { %v126_v1 = vld [vmem:[%s380_s2] sm:$0x1f]  ;;  %v287_v3 = vtrunc.f32 %v18_v0  ;;  %284 = vmatprep.mubr.msk.f32.mxu1 %vm134_vm1, %v18_v0  ;;  %v289_v6 = vtrunc.f32 %v19_v4  ;;  %v38_v7 = vld [vmem:[%s379_s1 + $0x10] sm:$0xff] }
   0x3   :  { %282 = vmatprep.subr.msk.mxu1 %vm141_vm0, %v126_v1 }
   0x4   :  { %283 = vmatpush3.msk.msra.mxu1 %vm141_vm0, %v126_v1 }
   0x5   :  { %9 = vsyncpa [#allocation3], 0  ;;  %v288_v8 = vcvt.f32.s32 %v287_v3  ;;  %285 = vmatmul.mubr.msk.f32.vlgmr.msra.gmra.mxu1 %vm134_vm1, %v19_v4  ;;  %271 = vmatprep.subr.msk.mxu0 %vm47_vm2, %v39_v5  ;;  %v37_v9 = vld [vmem:[%s379_s1 + $0x8] sm:$0xff]  ;;  %v290_v10 = vcvt.f32.s32 %v289_v6  ;;  %v36_v11 = vld [vmem:[%s379_s1] sm:$0xff]  ;;  %v22_v12 = vlaneseq  ;;  %vm40_vm3 = vcmask 203776   ;;  %s322_s28 = smov 96  }
   0x6   :  { %272 = vmatpush3.msk.msra.mxu0 %vm47_vm2, %v39_v5  ;;  %v321_v15 = vmov 0.0   ;;  %v258_v20 = vld [vmem:[%s381_s3] ss:$0 sm:$0xff]  ;;  %s323_s29 = smov [#allocation2]   ;;  %vm234_vm6 = vcmask 261120  }
   0x7   :  { %25 = vperm.xlu0 %297, %v288_v8   ;;  %273 = vmatprep.subr.mxu0 %v38_v7  ;;  %v23_v13 = vand.u32 127, %v22_v12  ;;  %s242_s30 = sshll.u32 %s323_s29, 4  ;;  %s243_s30 = int_to_ptr.vmem [resolvable:$true] %s242_s30 }
   0x8   :  { %274 = vmatpush3.msra.mxu0 %v38_v7  ;;  %s298_s3 = scalar_lea.vmem %s243_s30, 256  ;;  %p303_p1 = scmp.lt.s32.totalorder %s243_s30, %s243_s30 }
   0x9   :  { %275 = vmatprep.subr.mxu0 %v37_v9  ;;  %p299_p0 = scmp.ne.s32.totalorder %s243_s30, %s298_s3  ;;  %p304_p2 = scmp.lt.s32.totalorder %s298_s3, %s298_s3 }
   0xa   :  { %276 = vmatpush3.msra.mxu0 %v37_v9 }
   0xb   :  { %28 = vperm.xlu0 %297, %v290_v10   ;;  %277 = vmatprep.subr.mxu0 %v36_v11  ;;  %p305_p3 = por %p304_p2, %p303_p1 }
   0xc   :  { %278 = vmatpush3.msra.mxu0 %v36_v11 }
   0xd   :  { %p306_p4 = pnand %p305_p3, %p299_p0 }
  0x82   :  { %v26_v14 = vpop.permute.xlu0 %25 }
  0x83   :  { %vm30_vm4 = vcmp.eq.s32.totalorder %v23_v13, %v26_v14 }
  0x84   :  { %v253_v16 = vsel %vm30_vm4, 1.0, %v321_v15 }
  0x85   :  { %279 = vmatprep.mubr.msk.f32.mxu0 %vm40_vm3, %v253_v16 }
  0x86   :  { %v29_v17 = vpop.permute.xlu0 %28 }
  0x87   :  { %vm31_vm5 = vcmp.eq.s32.totalorder %v23_v13, %v29_v17 }
  0x88   :  { %v254_v18 = vsel %vm31_vm5, 1.0, %v321_v15 }
  0x89   :  { %280 = vmatmul.mubr.msk.f32.vlgmr.msra.gmra.mxu0 %vm40_vm3, %v254_v18 }
  0xc5   :  { %v286_v19 = vpop.f32.mrf.mxu1 }
  0xc6   :  { %v217_v23 = vadd.f32 %v286_v19, %v258_v20 }
  0xc7   :  { %v211_v21 = vpop.f32.mrf.mxu1 }
  0xc8   :  { %v212_v22 = vadd.f32 %v258_v20, %v211_v21 }
  0xca   :  { %224 = vrot.lane.b32.xlu1 %v212_v22, %s322_s28 }
  0xce   :  { %226 = vrot.lane.b32.xlu1 %v217_v23, %s322_s28 }
 0x13c   :  { %v225_v24 = vpop.permute.xlu1 %224 }
 0x140   :  { %v227_v27 = vpop.permute.xlu1 %226 }
 0x149   :  { %v281_v25 = vpop.f32.mrf.mxu0 }
 0x14a   :  { %v221_v26 = vmul.f32 %v281_v25, %v217_v23 }
 0x14b   :  { %v117_v28 = vpop.f32.mrf.mxu0 }
 0x14c   :  { %v231_v29 = vadd.f32 %v227_v27, %v221_v26  ;;  %v220_v30 = vmul.f32 %v212_v22, %v117_v28 }
 0x14e   :  { %v233_v31 = vmax.f32 %v231_v29, 0.0  ;;  %v230_v32 = vadd.f32 %v225_v24, %v220_v30 }
 0x150   :  { %236 = vst.msk [vmem:[#allocation2 + $0x8] sm:$0xff] %vm234_vm6, %v233_v31  ;;  %v232_v33 = vmax.f32 %v230_v32, 0.0 }
 0x152   :  { %235 = vst.msk [vmem:[#allocation2] sm:$0xff] %vm234_vm6, %v232_v33 }
 0x153   :  { %309 = shalt.err (!%p306_p4)
}
 0x154   :  { %s324_s5 = smov 128   ;;  %s325_s6 = smov 8  }
 0x155   :  { %248 = dma.vmem_to_hbm [thread:$0]  %s243_s30, 256, %s382_s4, [#allocation3], %s324_s5, %s324_s5, %s325_s6  }
 0x156   :  { %318 = dma.done.wait [#allocation3], 256  }
 0x157   :  { %319 = vsyncadd [#allocation3], 4294967040 }
 0x158   :  { %252 = vsyncpa [#allocation3], 1 }

</bundles_post_ra>
